<compile_context>
chip_gen: v6e
topology: v6e:2x2x1
jax: 0.10.0
libtpu: 0.0.40
codegen_flags: <defaults>
</compile_context>

<pallas_src>
import jax
import jax.numpy as jnp
from jax.experimental import pallas as pl
from jax.experimental.pallas import tpu as pltpu


_LANE = 128


def _round_up(n, m):
    return ((n + m - 1) // m) * m


def _mlp_kernel(x_ref, w1_ref, b1_ref, w2_ref, b2_ref, o_ref):
    # Two MXU matmuls + ReLU (VPU) + sigmoid (EUP), all on the VMEM-resident
    # block.  Biases are (1, F) rows; implicit broadcast in the add.
    x = x_ref[...]                                                    # (TM, X)
    h = jnp.dot(x, w1_ref[...],
                preferred_element_type=jnp.float32) + b1_ref[...]     # (TM, X)
    h = jnp.maximum(h, 0.0)                                           # ReLU
    z = jnp.dot(h, w2_ref[...],
                preferred_element_type=jnp.float32) + b2_ref[...]     # (TM, Zp)
    o_ref[...] = jax.nn.sigmoid(z).astype(o_ref.dtype)                # Sigmoid


def prepare_params(w1, b1, w2, b2):
    """One-time parameter prep (call once, outside the per-timestep hot path).

    Args:
      w1: (x_size, x_size)    PyTorch-layout (out, in) weight of Cz_lin.
      b1: (x_size,)           bias of Cz_lin.
      w2: (zhat_size, x_size) PyTorch-layout (out, in) weight of Cz_lin2.
      b2: (zhat_size,)        bias of Cz_lin2.
    Returns:
      (w1_t, b1_r, w2_t, b2_r, zhat_size) with weights transposed to (in, out),
      second layer zero-padded to a lane multiple, all float32.
    """
    x_size = w1.shape[0]
    z_size = w2.shape[0]
    z_pad = _round_up(z_size, _LANE)

    w1_t = jnp.asarray(w1, jnp.float32).T                       # (X, X)
    b1_r = jnp.asarray(b1, jnp.float32).reshape(1, x_size)      # (1, X)

    w2_t = jnp.zeros((x_size, z_pad), jnp.float32)
    w2_t = w2_t.at[:, :z_size].set(jnp.asarray(w2, jnp.float32).T)   # (X, Zp)
    b2_r = jnp.zeros((1, z_pad), jnp.float32)
    b2_r = b2_r.at[:, :z_size].set(jnp.asarray(b2, jnp.float32))     # (1, Zp)

    return (w1_t, b1_r, w2_t, b2_r, z_size)


def nonlinear_rnn_cell_z(x_t, params):
    """Single-timestep forward (same semantics as NonlinearRNNCellZ.forward).

    Gridless pallas_call: whole arrays live in VMEM, no pipeline prologue.
    """
    w1_t, b1_r, w2_t, b2_r, z_size = params
    B, X = x_t.shape
    Zp = w2_t.shape[1]
    if x_t.dtype != jnp.float32:
        x_t = x_t.astype(jnp.float32)

    vmem = pl.BlockSpec(memory_space=pltpu.MemorySpace.VMEM)
    out = pl.pallas_call(
        _mlp_kernel,
        out_shape=jax.ShapeDtypeStruct((B, Zp), jnp.float32),
        in_specs=[vmem, vmem, vmem, vmem, vmem],
        out_specs=vmem,
    )(x_t, w1_t, b1_r, w2_t, b2_r)
    return out[:, :z_size]


def nonlinear_rnn_cell_z_seq(x_seq, params, tm=256):
    """Fused application of the cell over a whole sequence.

    x_seq: (T, B, x_size).  The cell is stateless in x_t, so the timestep loop
    is fused into one pallas_call: rows (T*B) stream through a grid axis while
    the weights stay resident in VMEM (their index_map always returns (0, 0)).
    """
    w1_t, b1_r, w2_t, b2_r, z_size = params
    T, B, X = x_seq.shape
    Zp = w2_t.shape[1]
    N = T * B

    x_flat = x_seq.reshape(N, X)
    if x_flat.dtype != jnp.float32:
        x_flat = x_flat.astype(jnp.float32)

    tm = min(tm, _round_up(N, 8))
    n_pad = (-N) % tm
    if n_pad:
        x_flat = jnp.concatenate(
            [x_flat, jnp.zeros((n_pad, X), jnp.float32)], axis=0)
    n_rows = N + n_pad
    grid = (n_rows // tm,)

    out = pl.pallas_call(
        _mlp_kernel,
        out_shape=jax.ShapeDtypeStruct((n_rows, Zp), jnp.float32),
        grid=grid,
        in_specs=[
            pl.BlockSpec((tm, X), lambda i: (i, 0)),   # x streams
            pl.BlockSpec((X, X), lambda i: (0, 0)),    # W1 resident
            pl.BlockSpec((1, X), lambda i: (0, 0)),    # b1 resident
            pl.BlockSpec((X, Zp), lambda i: (0, 0)),   # W2 resident
            pl.BlockSpec((1, Zp), lambda i: (0, 0)),   # b2 resident
        ],
        out_specs=pl.BlockSpec((tm, Zp), lambda i: (i, 0)),
        compiler_params=pltpu.CompilerParams(
            dimension_semantics=("parallel",)),
    )(x_flat, w1_t, b1_r, w2_t, b2_r)

    return out[:N, :z_size].reshape(T, B, z_size)


if __name__ == "__main__":
    # Small shapes consistent with the module's forward.
    B, X_SIZE, ZHAT_SIZE, T = 8, 32, 16, 64

    key = jax.random.PRNGKey(0)
    kx, ks, kw1, kb1, kw2, kb2 = jax.random.split(key, 6)

    # Deterministic synthetic parameters (PyTorch nn.Linear shapes: (out, in)).
    bound1 = 1.0 / jnp.sqrt(X_SIZE)
    w1 = jax.random.uniform(kw1, (X_SIZE, X_SIZE), jnp.float32, -bound1, bound1)
    b1 = jax.random.uniform(kb1, (X_SIZE,), jnp.float32, -bound1, bound1)
    w2 = jax.random.uniform(kw2, (ZHAT_SIZE, X_SIZE), jnp.float32,
                            -bound1, bound1)
    b2 = jax.random.uniform(kb2, (ZHAT_SIZE,), jnp.float32, -bound1, bound1)

    # One-time parameter prep (no per-call transposes/casts).
    params = prepare_params(w1, b1, w2, b2)

    x_t = jax.random.normal(kx, (B, X_SIZE), jnp.float32)
    x_seq = jax.random.normal(ks, (T, B, X_SIZE), jnp.float32)

    def ref_fn(x):  # pure-JAX reference (float32)
        return jax.nn.sigmoid(jnp.maximum(x @ w1.T + b1, 0.0) @ w2.T + b2)

    # Single-step path (matches the module's forward(x_t)).
    out1 = jax.block_until_ready(nonlinear_rnn_cell_z(x_t, params))
    assert out1.shape == (B, ZHAT_SIZE)
    assert jnp.allclose(out1, ref_fn(x_t), atol=1e-5, rtol=1e-5)

    # Fused-over-timesteps path (weights resident across the grid).
    out_seq = jax.block_until_ready(nonlinear_rnn_cell_z_seq(x_seq, params))
    ref_seq = ref_fn(x_seq.reshape(-1, X_SIZE)).reshape(T, B, ZHAT_SIZE)
    assert out_seq.shape == (T, B, ZHAT_SIZE)
    assert jnp.allclose(out_seq, ref_seq, atol=1e-5, rtol=1e-5)

    print("KERNEL_OK")
</pallas_src>

<mosaic_0001>
module attributes {stable_mosaic.version = 11 : i64} {
  func.func @_mlp_kernel(%arg0: memref<8x32xf32, #tpu.memory_space<vmem>>, %arg1: memref<32x32xf32, #tpu.memory_space<vmem>>, %arg2: memref<1x32xf32, #tpu.memory_space<vmem>>, %arg3: memref<32x128xf32, #tpu.memory_space<vmem>>, %arg4: memref<1x128xf32, #tpu.memory_space<vmem>>, %arg5: memref<8x128xf32, #tpu.memory_space<vmem>>) attributes {dimension_semantics = [], scalar_prefetch = 0 : i64, scratch_operands = 0 : i64, tpu.core_type = #tpu.core_type<tc>} {
    %c0 = arith.constant 0 : index
    %c0_0 = arith.constant 0 : index
    %0 = vector.load %arg0[%c0, %c0_0] : memref<8x32xf32, #tpu.memory_space<vmem>>, vector<8x32xf32>
    %c0_1 = arith.constant 0 : index
    %c0_2 = arith.constant 0 : index
    %1 = vector.load %arg1[%c0_1, %c0_2] : memref<32x32xf32, #tpu.memory_space<vmem>>, vector<32x32xf32>
    %cst = arith.constant dense<0.000000e+00> : vector<8x32xf32>
    %2 = tpu.matmul %0, %1, %cst {dimension_numbers = #tpu.dot_dimension_numbers<[1], [0], [0], [1], [0, 0, 1, 1], [], []>} : vector<8x32xf32>, vector<32x32xf32>, vector<8x32xf32> -> vector<8x32xf32>
    %c0_3 = arith.constant 0 : index
    %c0_4 = arith.constant 0 : index
    %3 = vector.load %arg2[%c0_3, %c0_4] : memref<1x32xf32, #tpu.memory_space<vmem>>, vector<1x32xf32>
    %4 = vector.broadcast %3 : vector<1x32xf32> to vector<8x32xf32>
    %5 = arith.addf %2, %4 : vector<8x32xf32>
    %cst_5 = arith.constant 0.000000e+00 : f32
    %6 = vector.broadcast %cst_5 : f32 to vector<8x32xf32>
    %7 = arith.maximumf %5, %6 : vector<8x32xf32>
    %c0_6 = arith.constant 0 : index
    %c0_7 = arith.constant 0 : index
    %8 = vector.load %arg3[%c0_6, %c0_7] : memref<32x128xf32, #tpu.memory_space<vmem>>, vector<32x128xf32>
    %cst_8 = arith.constant dense<0.000000e+00> : vector<8x128xf32>
    %9 = tpu.matmul %7, %8, %cst_8 {dimension_numbers = #tpu.dot_dimension_numbers<[1], [0], [0], [1], [0, 0, 1, 1], [], []>} : vector<8x32xf32>, vector<32x128xf32>, vector<8x128xf32> -> vector<8x128xf32>
    %c0_9 = arith.constant 0 : index
    %c0_10 = arith.constant 0 : index
    %10 = vector.load %arg4[%c0_9, %c0_10] : memref<1x128xf32, #tpu.memory_space<vmem>>, vector<1x128xf32>
    %11 = vector.broadcast %10 : vector<1x128xf32> to vector<8x128xf32>
    %12 = arith.addf %9, %11 : vector<8x128xf32>
    %13 = arith.negf %12 : vector<8x128xf32>
    %14 = math.exp %13 : vector<8x128xf32>
    %cst_11 = arith.constant 1.000000e+00 : f32
    %15 = vector.broadcast %cst_11 : f32 to vector<8x128xf32>
    %16 = arith.addf %15, %14 : vector<8x128xf32>
    %17 = arith.divf %15, %16 : vector<8x128xf32>
    %c0_12 = arith.constant 0 : index
    %c0_13 = arith.constant 0 : index
    %18 = vector.load %arg5[%c0_12, %c0_13] : memref<8x128xf32, #tpu.memory_space<vmem>>, vector<8x128xf32>
    tpu.vector_store %arg5[%c0_12, %c0_13], %17 {strides = array<i32>} : memref<8x128xf32, #tpu.memory_space<vmem>>, vector<8x128xf32>,
    return
  }
}

</mosaic_0001>

<bundles_post_ra>
// kernel: tpu_custom_call.1
= control target key start
LH: loop header
LB: loop body
LE: loop exit
PB: predicated region body
PF: predicated region fallthrough
CT: control target
= control target key end

     0   :  { %10 = vsyncpa [#allocation3], 0  ;;  %s447_s0 = inlined_call_operand.hbm [shape: f32[8,32], index: 0, kind: input, shape index: {}]   ;;  %s448_s1 = inlined_call_operand.hbm [shape: f32[32,32], index: 1, kind: input, shape index: {}]   ;;  %s449_s2 = inlined_call_operand.vmem [shape: f32[1,32], index: 2, kind: input, shape index: {}]   ;;  %s450_s3 = inlined_call_operand.hbm [shape: f32[32,128], index: 3, kind: input, shape index: {}]   ;;  %s451_s4 = inlined_call_operand.vmem [shape: f32[1,128], index: 4, kind: input, shape index: {}]   ;;  %s452_s5 = inlined_call_operand.hbm [shape: f32[8,128], index: 5, kind: output, shape index: {}]  }
   0x1   :  { %11 = vsyncpa [#allocation6], 0 }
   0x2   :  { %12 = vsyncpa [#allocation4], 0  ;;  %s389_s18 = smov [#allocation5]  }
   0x3   :  { %s28_s19 = sshll.u32 %s389_s18, 4  ;;  %s29_s19 = int_to_ptr.vmem [resolvable:$true] %s28_s19 }
   0x4   :  { %s311_s20 = scalar_lea.vmem %s29_s19, 512  ;;  %p316_p1 = scmp.lt.s32.totalorder %s29_s19, %s29_s19 }
   0x5   :  { %p312_p0 = scmp.ne.s32.totalorder %s29_s19, %s311_s20  ;;  %p317_p2 = scmp.lt.s32.totalorder %s311_s20, %s311_s20 }
   0x7   :  { %p318_p3 = por %p317_p2, %p316_p1 }
   0x9   :  { %p319_p4 = pnand %p318_p3, %p312_p0 }
   0xb   :  { %322 = shalt.err (!%p319_p4)
}
   0xc   :  { %s390_s21 = smov 128   ;;  %s391_s22 = smov 8  }
   0xd   :  { %34 = dma.hbm_to_vmem [thread:$0]  %s448_s1, 512, %s29_s19, [#allocation6], %s390_s21, %s390_s21, %s391_s22  }
   0xe   :  { %s392_s25 = smov [#allocation2]   ;;  %s393_s27 = smov [#allocation7]  }
   0xf   :  { %s19_s26 = sshll.u32 %s392_s25, 4  ;;  %s42_s28 = sshll.u32 %s393_s27, 4  ;;  %s20_s26 = int_to_ptr.vmem [resolvable:$true] %s19_s26  ;;  %s43_s28 = int_to_ptr.vmem [resolvable:$true] %s42_s28 }
  0x10   :  { %s331_s29 = scalar_lea.vmem %s20_s26, 128  ;;  %p336_p6 = scmp.lt.s32.totalorder %s20_s26, %s20_s26 }
  0x11   :  { %p332_p5 = scmp.ne.s32.totalorder %s20_s26, %s331_s29  ;;  %p337_p7 = scmp.lt.s32.totalorder %s331_s29, %s331_s29 }
  0x13   :  { %p338_p8 = por %p337_p7, %p336_p6 }
  0x15   :  { %p339_p9 = pnand %p338_p8, %p332_p5 }
  0x17   :  { %342 = shalt.err (!%p339_p9)
}
  0x18   :  { %22 = dma.hbm_to_vmem [thread:$0]  %s447_s0, 128, %s20_s26, [#allocation3]  }
  0x19   :  { %s351_s7 = scalar_lea.vmem %s43_s28, 512  ;;  %p356_p11 = scmp.lt.s32.totalorder %s43_s28, %s43_s28 }
  0x1a   :  { %p352_p10 = scmp.ne.s32.totalorder %s43_s28, %s351_s7  ;;  %p357_p12 = scmp.lt.s32.totalorder %s351_s7, %s351_s7 }
  0x1c   :  { %p358_p13 = por %p357_p12, %p356_p11 }
  0x1e   :  { %p359_p0 = pnand %p358_p13, %p352_p10 }
  0x20   :  { %362 = shalt.err (!%p359_p0)
}
  0x21   :  { %48 = dma.hbm_to_vmem [thread:$0]  %s450_s3, 512, %s43_s28, [#allocation6], %s390_s21, %s390_s21, %s391_s22  }
  0x22   :  { %383 = dma.done.wait [#allocation3], 128  }
  0x23   :  { %384 = vsyncadd [#allocation3], 4294967168 }
  0x24   :  { %385 = dma.done.wait [#allocation6], 1024  }
  0x25   :  { %386 = vsyncadd [#allocation6], 4294966272  ;;  %v394_v0 = vmov 0.0   ;;  %vm395_vm0 = vmmov 0   ;;  %v64_v1 = vld [vmem:[#allocation5 + $0x18] sm:$0xff]  ;;  %v63_v2 = vld [vmem:[#allocation5 + $0x10] sm:$0xff] }
  0x26   :  { %269 = vmatprep.subr.mxu0 %v394_v0  ;;  %277 = vmatprep.mubr.msk.f32.mxu0 %vm395_vm0, %v394_v0  ;;  %v150_v3 = vld [vmem:[#allocation7 + $0x18] sm:$0xff]  ;;  %v62_v4 = vld [vmem:[#allocation5 + $0x8] sm:$0xff]  ;;  %v61_v5 = vld [vmem:[#allocation5] sm:$0xff]  ;;  %vm72_vm1 = vcmask 261120   ;;  %s396_s11 = smov [#allocation8]  }
  0x27   :  { %280 = vmatprep.subr.mxu1 %v394_v0  ;;  %288 = vmatprep.mubr.msk.f32.mxu1 %vm395_vm0, %v394_v0  ;;  %v60_v6 = vld [vmem:[#allocation2] sm:$0xff]  ;;  %v149_v7 = vld [vmem:[#allocation7 + $0x10] sm:$0xff]  ;;  %v148_v8 = vld [vmem:[#allocation7 + $0x8] sm:$0xff] }
  0x28   :  { %270 = vmatpush3.msra.mxu0 %v64_v1  ;;  %281 = vmatpush3.msra.mxu1 %v150_v3  ;;  %v147_v9 = vld [vmem:[#allocation7] sm:$0xff]  ;;  %v254_v10 = vld [vmem:[%s449_s2] ss:$0 sm:$0xff]  ;;  %s244_s2 = sshll.u32 %s396_s11, 4  ;;  %s245_s2 = int_to_ptr.vmem [resolvable:$true] %s244_s2 }
  0x29   :  { %271 = vmatprep.subr.mxu0 %v394_v0  ;;  %282 = vmatprep.subr.mxu1 %v394_v0  ;;  %v256_v15 = vld [vmem:[%s451_s4] ss:$0 sm:$0xff]  ;;  %s363_s12 = scalar_lea.vmem %s245_s2, 128  ;;  %p368_p2 = scmp.lt.s32.totalorder %s245_s2, %s245_s2 }
  0x2a   :  { %272 = vmatpush3.msra.mxu0 %v63_v2  ;;  %283 = vmatpush3.msra.mxu1 %v149_v7  ;;  %p364_p1 = scmp.ne.s32.totalorder %s245_s2, %s363_s12  ;;  %p369_p3 = scmp.lt.s32.totalorder %s363_s12, %s363_s12 }
  0x2b   :  { %273 = vmatprep.subr.mxu0 %v394_v0  ;;  %284 = vmatprep.subr.mxu1 %v394_v0 }
  0x2c   :  { %274 = vmatpush3.msra.mxu0 %v62_v4  ;;  %285 = vmatpush3.msra.mxu1 %v148_v8  ;;  %p370_p4 = por %p369_p3, %p368_p2 }
  0x2d   :  { %275 = vmatprep.subr.mxu0 %v394_v0  ;;  %286 = vmatprep.subr.mxu1 %v394_v0 }
  0x2e   :  { %276 = vmatpush3.msra.mxu0 %v61_v5  ;;  %287 = vmatpush3.msra.mxu1 %v147_v9  ;;  %p371_p5 = pnand %p370_p4, %p364_p1 }
  0x2f   :  { %278 = vmatmul.mubr.msk.f32.vlgmr.msra.gmra.mxu0 %vm72_vm1, %v60_v6 }
  0xef   :  { %v142_v11 = vpop.f32.mrf.mxu0 }
  0xf0   :  { %v143_v12 = vadd.f32 %v254_v10, %v142_v11 }
  0xf1   :  { %v279_v13 = vpop.f32.mrf.mxu0 }
  0xf2   :  { %v146_v14 = vmax.f32 %v143_v12, 0.0 }
  0xf4   :  { %289 = vmatmul.mubr.msk.f32.vlgmr.msra.gmra.mxu1 %vm72_vm1, %v146_v14 }
 0x1b4   :  { %v227_v16 = vpop.f32.mrf.mxu1 }
 0x1b5   :  { %v228_v17 = vadd.f32 %v256_v15, %v227_v16 }
 0x1b6   :  { %v290_v18 = vpop.f32.mrf.mxu1 }
 0x1b7   :  { %v258_v19 = vmul.f32 -1.442695, %v228_v17 }
 0x1b9   :  { %299 = vpow2.f32 %v258_v19 }
 0x1c6   :  { %v300_v20 = vpop.eup %299 }
 0x1c7   :  { %v234_v21 = vadd.f32 1.0, %v300_v20 }
 0x1c9   :  { %301 = vrcp.f32 %v234_v21 }
 0x1d6   :  { %v302_v22 = vpop.eup %301 }
 0x1d7   :  { %237 = vst [vmem:[#allocation8] sm:$0xff] %v302_v22 }
 0x1d8   :  { %374 = shalt.err (!%p371_p5)
}
 0x1d9   :  { %247 = dma.vmem_to_hbm [thread:$0]  %s245_s2, 128, %s452_s5, [#allocation4]  }
 0x1da   :  { %387 = dma.done.wait [#allocation4], 128  }
 0x1db   :  { %388 = vsyncadd [#allocation4], 4294967168 }
 0x1dc   :  { %251 = vsyncpa [#allocation3], 1 }
 0x1dd   :  { %252 = vsyncpa [#allocation6], 1 }
 0x1de   :  { %253 = vsyncpa [#allocation4], 1 }

</bundles_post_ra>
